<compile_context>
chip_gen: v7x
topology: tpu7x:2x2x1
jax: 0.10.0
libtpu: 0.0.40
codegen_flags: <defaults>
</compile_context>

<pallas_src>
import functools

import jax
import jax.numpy as jnp
from jax.experimental import pallas as pl
from jax.experimental.pallas import tpu as pltpu

TM = 128   # node-row tile
TK = 128   # node-column (reduction) tile
HP = 128   # hidden channels padded to full 128-lane width


def _round_up(n, m):
    return ((n + m - 1) // m) * m


# ---------------------------------------------------------------------------
# Stage 1: per row tile i, accumulate (A @ X)[i] over k; at the last k step
#   h1    = relu( (A@X)[i] @ W1 + b1 )      (f32 epilogue)
#   m1[i] = h1 @ W2                         (layer-2 feature transform fused)
# ---------------------------------------------------------------------------
def gcn_stage1_kernel(a_ref, x_ref, w1_ref, b1_ref, w2_ref, m1_ref, acc_ref):
    k = pl.program_id(1)

    @pl.when(k == 0)
    def _():
        acc_ref[...] = jnp.zeros_like(acc_ref)

    acc_ref[...] += jnp.dot(a_ref[...], x_ref[...],
                            preferred_element_type=jnp.float32)

    @pl.when(k == pl.num_programs(1) - 1)
    def _():
        h1 = jnp.dot(acc_ref[...], w1_ref[...],
                     preferred_element_type=jnp.float32) + b1_ref[...]
        h1 = jnp.maximum(h1, 0.0)
        m1 = jnp.dot(h1.astype(jnp.bfloat16), w2_ref[...],
                     preferred_element_type=jnp.float32)
        m1_ref[...] = m1.astype(jnp.bfloat16)


# ---------------------------------------------------------------------------
# Stage 2: per row tile i, accumulate (A @ M1)[i] over k; at the last k step
#   h2        = relu( acc + b2 )                       (f32 epilogue)
#   partial_i = P[:, i-tile] @ h2                      (folded mean-pool)
# ---------------------------------------------------------------------------
def gcn_stage2_kernel(a_ref, m1_ref, b2_ref, p_ref, part_ref, acc_ref):
    k = pl.program_id(1)

    @pl.when(k == 0)
    def _():
        acc_ref[...] = jnp.zeros_like(acc_ref)

    acc_ref[...] += jnp.dot(a_ref[...], m1_ref[...],
                            preferred_element_type=jnp.float32)

    @pl.when(k == pl.num_programs(1) - 1)
    def _():
        h2 = jnp.maximum(acc_ref[...] + b2_ref[...], 0.0)          # (TM, HP)
        part_ref[0] = jnp.dot(p_ref[...], h2,
                              preferred_element_type=jnp.float32)  # (G, HP)


# ---------------------------------------------------------------------------
# Graph glue (plain JAX): normalized adjacency and mean-pool matrix.
# ---------------------------------------------------------------------------
def build_norm_adj(edge_index, num_nodes):
    """D^{-1/2} (A + I) D^{-1/2} as a dense (N, N) matrix (PyG gcn_norm)."""
    src, dst = edge_index[0], edge_index[1]
    loops = jnp.arange(num_nodes, dtype=src.dtype)
    src = jnp.concatenate([src, loops])
    dst = jnp.concatenate([dst, loops])
    a = jnp.zeros((num_nodes, num_nodes), jnp.float32).at[dst, src].add(1.0)
    deg = a.sum(axis=1)
    dinv = jnp.where(deg > 0, 1.0 / jnp.sqrt(deg), 0.0)
    return dinv[:, None] * a * dinv[None, :]


def build_mean_pool(batch, num_graphs):
    """(G, N) matrix s.t. P @ H = per-graph mean of node features."""
    onehot = (batch[None, :] == jnp.arange(num_graphs)[:, None]).astype(jnp.float32)
    counts = onehot.sum(axis=1, keepdims=True)
    return onehot / jnp.maximum(counts, 1.0)


# ---------------------------------------------------------------------------
# Forward wrapper.
# ---------------------------------------------------------------------------
@functools.partial(jax.jit, static_argnames=("num_graphs",))
def adams_gcn_forward(x, edge_index, batch, params, num_graphs):
    w1, b1, w2, b2, wo, bo = params
    n, f_in = x.shape
    hidden = w1.shape[1]
    assert hidden <= HP, "hidden_channels must be <= 128 for this padding"

    a = build_norm_adj(edge_index, n)                    # (n, n) f32
    pool = build_mean_pool(batch, num_graphs)            # (G, n) f32

    # Pad node dim to the tile size and hidden dim to 128 lanes.
    n_pad = max(_round_up(n, max(TM, TK)), max(TM, TK))
    a_pad = jnp.zeros((n_pad, n_pad), jnp.float32).at[:n, :n].set(a)
    x_pad = jnp.zeros((n_pad, f_in), jnp.float32).at[:n, :].set(x)
    p_pad = jnp.zeros((num_graphs, n_pad), jnp.float32).at[:, :n].set(pool)
    w1_p = jnp.zeros((f_in, HP), jnp.float32).at[:, :hidden].set(w1)
    b1_p = jnp.zeros((1, HP), jnp.float32).at[:, :hidden].set(jnp.reshape(b1, (1, -1)))
    w2_p = jnp.zeros((HP, HP), jnp.float32).at[:hidden, :hidden].set(w2)
    b2_p = jnp.zeros((1, HP), jnp.float32).at[:, :hidden].set(jnp.reshape(b2, (1, -1)))

    # bf16 operands for the MXU; accumulation stays f32 inside the kernels.
    a_bf = a_pad.astype(jnp.bfloat16)
    x_bf = x_pad.astype(jnp.bfloat16)
    w2_bf = w2_p.astype(jnp.bfloat16)

    nm, nk = n_pad // TM, n_pad // TK
    cparams = pltpu.CompilerParams(
        dimension_semantics=("parallel", "arbitrary"),
        vmem_limit_bytes=32 * 1024 * 1024)

    # ---- stage 1: M1 = relu((A @ X) @ W1 + b1) @ W2 -----------------------
    m1 = pl.pallas_call(
        gcn_stage1_kernel,
        out_shape=jax.ShapeDtypeStruct((n_pad, HP), jnp.bfloat16),
        grid_spec=pltpu.PrefetchScalarGridSpec(
            num_scalar_prefetch=0,
            grid=(nm, nk),
            in_specs=[
                pl.BlockSpec((TM, TK), lambda i, k: (i, k)),     # A_hat tile
                pl.BlockSpec((TK, f_in), lambda i, k: (k, 0)),   # X tile
                pl.BlockSpec((f_in, HP), lambda i, k: (0, 0)),   # W1 (tiny)
                pl.BlockSpec((1, HP), lambda i, k: (0, 0)),      # b1 (tiny)
                pl.BlockSpec((HP, HP), lambda i, k: (0, 0)),     # W2
            ],
            out_specs=pl.BlockSpec((TM, HP), lambda i, k: (i, 0)),
            scratch_shapes=[pltpu.VMEM((TM, f_in), jnp.float32)],
        ),
        compiler_params=cparams,
    )(a_bf, x_bf, w1_p, b1_p, w2_bf)

    # ---- stage 2: per-row-tile pooled partials of relu(A @ M1 + b2) -------
    partials = pl.pallas_call(
        gcn_stage2_kernel,
        out_shape=jax.ShapeDtypeStruct((nm, num_graphs, HP), jnp.float32),
        grid_spec=pltpu.PrefetchScalarGridSpec(
            num_scalar_prefetch=0,
            grid=(nm, nk),
            in_specs=[
                pl.BlockSpec((TM, TK), lambda i, k: (i, k)),          # A_hat
                pl.BlockSpec((TK, HP), lambda i, k: (k, 0)),          # M1 tile
                pl.BlockSpec((1, HP), lambda i, k: (0, 0)),           # b2
                pl.BlockSpec((num_graphs, TM), lambda i, k: (0, i)),  # pool
            ],
            out_specs=pl.BlockSpec((1, num_graphs, HP),
                                   lambda i, k: (i, 0, 0)),
            scratch_shapes=[pltpu.VMEM((TM, HP), jnp.float32)],
        ),
        compiler_params=cparams,
    )(a_bf, m1, b2_p, p_pad)

    pooled = partials.sum(axis=0)                         # (G, HP) f32
    # Tiny lane-sparse epilogue (G x hidden) @ (hidden x out): plain JAX.
    return pooled[:, :hidden] @ wo + jnp.reshape(bo, (1, -1))


# ---------------------------------------------------------------------------
# Reference (pure JAX, f32) for a sanity check.
# ---------------------------------------------------------------------------
def reference_forward(x, edge_index, batch, params, num_graphs):
    w1, b1, w2, b2, wo, bo = params
    a = build_norm_adj(edge_index, x.shape[0])
    pool = build_mean_pool(batch, num_graphs)
    h = jnp.maximum(a @ (x @ w1) + jnp.reshape(b1, (1, -1)), 0.0)
    h = jnp.maximum(a @ (h @ w2) + jnp.reshape(b2, (1, -1)), 0.0)
    p = pool @ h
    return p @ wo + jnp.reshape(bo, (1, -1))


def glorot(key, shape):
    fan_in, fan_out = shape
    limit = jnp.sqrt(6.0 / (fan_in + fan_out))
    return jax.random.uniform(key, shape, jnp.float32, -limit, limit)


if __name__ == "__main__":
    # Small synthetic problem: 2 graphs of 8 nodes each, 8 input features,
    # hidden_channels=24 (module default), out_channels=1.
    N, F_IN, HIDDEN, OUT, G = 16, 8, 24, 1, 2

    key = jax.random.PRNGKey(0)
    k_x, k_w1, k_w2, k_wo = jax.random.split(key, 4)

    x = jax.random.normal(k_x, (N, F_IN), jnp.float32)

    # Undirected chain within each graph of 8 nodes (GCNConv adds self-loops).
    src_list, dst_list = [], []
    for g in range(G):
        base = g * 8
        for i in range(7):
            src_list += [base + i, base + i + 1]
            dst_list += [base + i + 1, base + i]
    edge_index = jnp.array([src_list, dst_list], dtype=jnp.int32)
    batch = jnp.repeat(jnp.arange(G, dtype=jnp.int32), 8)

    params = (
        glorot(k_w1, (F_IN, HIDDEN)), jnp.zeros((1, HIDDEN), jnp.float32),
        glorot(k_w2, (HIDDEN, HIDDEN)), jnp.zeros((1, HIDDEN), jnp.float32),
        glorot(k_wo, (HIDDEN, OUT)), jnp.zeros((1, OUT), jnp.float32),
    )

    out = adams_gcn_forward(x, edge_index, batch, params, num_graphs=G)
    out = jax.block_until_ready(out)
    assert out.shape == (G, OUT)
    assert bool(jnp.all(jnp.isfinite(out)))

    ref = reference_forward(x, edge_index, batch, params, G)
    assert bool(jnp.allclose(out, ref, atol=5e-2, rtol=5e-2)), (
        f"mismatch: kernel={out}, ref={ref}")

    print("KERNEL_OK")
</pallas_src>

<mosaic_0001>
module attributes {stable_mosaic.version = 11 : i64} {
  func.func @gcn_stage1_kernel(%arg0: i32, %arg1: i32, %arg2: memref<128x128xbf16, #tpu.memory_space<vmem>>, %arg3: memref<128x8xbf16, #tpu.memory_space<vmem>>, %arg4: memref<8x128xf32, #tpu.memory_space<vmem>>, %arg5: memref<1x128xf32, #tpu.memory_space<vmem>>, %arg6: memref<128x128xbf16, #tpu.memory_space<vmem>>, %arg7: memref<128x128xbf16, #tpu.memory_space<vmem>>, %arg8: memref<128x8xf32, #tpu.memory_space<vmem>>) attributes {dimension_semantics = [#tpu.dimension_semantics<parallel>, #tpu.dimension_semantics<arbitrary>], iteration_bounds = array<i64: 1, 1>, scalar_prefetch = 0 : i64, scratch_operands = 1 : i64, tpu.core_type = #tpu.core_type<tc>, window_params = [{transform_indices = @transform_0, window_bounds = array<i64: 128, 128>}, {transform_indices = @transform_1, window_bounds = array<i64: 128, 8>}, {pipeline_mode = #tpu.pipeline_mode<synchronous>, transform_indices = @transform_2, window_bounds = array<i64: 8, 128>}, {pipeline_mode = #tpu.pipeline_mode<synchronous>, transform_indices = @transform_3, window_bounds = array<i64: 1, 128>}, {pipeline_mode = #tpu.pipeline_mode<synchronous>, transform_indices = @transform_4, window_bounds = array<i64: 128, 128>}, {transform_indices = @transform_5, window_bounds = array<i64: 128, 128>}]} {
    %c0_i32 = arith.constant 0 : i32
    %0 = arith.cmpi eq, %arg1, %c0_i32 : i32
    %1 = arith.extui %0 : i1 to i32
    %c0_i32_0 = arith.constant 0 : i32
    %2 = arith.cmpi ne, %1, %c0_i32_0 : i32
    scf.if %2 {
      %cst_10 = arith.constant 0.000000e+00 : f32
      %12 = vector.broadcast %cst_10 : f32 to vector<128x8xf32>
      %c0_11 = arith.constant 0 : index
      %c0_12 = arith.constant 0 : index
      %13 = vector.load %arg8[%c0_11, %c0_12] : memref<128x8xf32, #tpu.memory_space<vmem>>, vector<128x8xf32>
      tpu.vector_store %arg8[%c0_11, %c0_12], %12 {strides = array<i32>} : memref<128x8xf32, #tpu.memory_space<vmem>>, vector<128x8xf32>,
    } else {
    }
    %c0 = arith.constant 0 : index
    %c0_1 = arith.constant 0 : index
    %3 = vector.load %arg8[%c0, %c0_1] : memref<128x8xf32, #tpu.memory_space<vmem>>, vector<128x8xf32>
    %c0_2 = arith.constant 0 : index
    %c0_3 = arith.constant 0 : index
    %4 = vector.load %arg2[%c0_2, %c0_3] : memref<128x128xbf16, #tpu.memory_space<vmem>>, vector<128x128xbf16>
    %c0_4 = arith.constant 0 : index
    %c0_5 = arith.constant 0 : index
    %5 = vector.load %arg3[%c0_4, %c0_5] : memref<128x8xbf16, #tpu.memory_space<vmem>>, vector<128x8xbf16>
    %cst = arith.constant dense<0.000000e+00> : vector<128x8xf32>
    %6 = tpu.matmul %4, %5, %cst {dimension_numbers = #tpu.dot_dimension_numbers<[1], [0], [0], [1], [0, 0, 1, 1], [], []>} : vector<128x128xbf16>, vector<128x8xbf16>, vector<128x8xf32> -> vector<128x8xf32>
    %7 = arith.addf %3, %6 : vector<128x8xf32>
    %c0_6 = arith.constant 0 : index
    %c0_7 = arith.constant 0 : index
    %8 = vector.load %arg8[%c0_6, %c0_7] : memref<128x8xf32, #tpu.memory_space<vmem>>, vector<128x8xf32>
    tpu.vector_store %arg8[%c0_6, %c0_7], %7 {strides = array<i32>} : memref<128x8xf32, #tpu.memory_space<vmem>>, vector<128x8xf32>,
    %c0_i32_8 = arith.constant 0 : i32
    %9 = arith.cmpi eq, %arg1, %c0_i32_8 : i32
    %10 = arith.extui %9 : i1 to i32
    %c0_i32_9 = arith.constant 0 : i32
    %11 = arith.cmpi ne, %10, %c0_i32_9 : i32
    scf.if %11 {
      %c0_10 = arith.constant 0 : index
      %c0_11 = arith.constant 0 : index
      %12 = vector.load %arg8[%c0_10, %c0_11] : memref<128x8xf32, #tpu.memory_space<vmem>>, vector<128x8xf32>
      %c0_12 = arith.constant 0 : index
      %c0_13 = arith.constant 0 : index
      %13 = vector.load %arg4[%c0_12, %c0_13] : memref<8x128xf32, #tpu.memory_space<vmem>>, vector<8x128xf32>
      %cst_14 = arith.constant dense<0.000000e+00> : vector<128x128xf32>
      %14 = tpu.matmul %12, %13, %cst_14 {dimension_numbers = #tpu.dot_dimension_numbers<[1], [0], [0], [1], [0, 0, 1, 1], [], []>} : vector<128x8xf32>, vector<8x128xf32>, vector<128x128xf32> -> vector<128x128xf32>
      %c0_15 = arith.constant 0 : index
      %c0_16 = arith.constant 0 : index
      %15 = vector.load %arg5[%c0_15, %c0_16] : memref<1x128xf32, #tpu.memory_space<vmem>>, vector<1x128xf32>
      %16 = vector.broadcast %15 : vector<1x128xf32> to vector<128x128xf32>
      %17 = arith.addf %14, %16 : vector<128x128xf32>
      %cst_17 = arith.constant 0.000000e+00 : f32
      %18 = vector.broadcast %cst_17 : f32 to vector<128x128xf32>
      %19 = arith.maximumf %17, %18 : vector<128x128xf32>
      %20 = arith.truncf %19 : vector<128x128xf32> to vector<128x128xbf16>
      %c0_18 = arith.constant 0 : index
      %c0_19 = arith.constant 0 : index
      %21 = vector.load %arg6[%c0_18, %c0_19] : memref<128x128xbf16, #tpu.memory_space<vmem>>, vector<128x128xbf16>
      %cst_20 = arith.constant dense<0.000000e+00> : vector<128x128xf32>
      %22 = tpu.matmul %20, %21, %cst_20 {dimension_numbers = #tpu.dot_dimension_numbers<[1], [0], [0], [1], [0, 0, 1, 1], [], []>} : vector<128x128xbf16>, vector<128x128xbf16>, vector<128x128xf32> -> vector<128x128xf32>
      %23 = arith.truncf %22 : vector<128x128xf32> to vector<128x128xbf16>
      %c0_21 = arith.constant 0 : index
      %c0_22 = arith.constant 0 : index
      %24 = vector.load %arg7[%c0_21, %c0_22] : memref<128x128xbf16, #tpu.memory_space<vmem>>, vector<128x128xbf16>
      tpu.vector_store %arg7[%c0_21, %c0_22], %23 {strides = array<i32>} : memref<128x128xbf16, #tpu.memory_space<vmem>>, vector<128x128xbf16>,
    } else {
    }
    return
  }
  func.func @transform_0(%arg0: i32, %arg1: i32) -> (i32, i32) {
    %c0_i32 = arith.constant 0 : i32
    return %arg0, %arg1 : i32, i32
  }
  func.func @transform_1(%arg0: i32, %arg1: i32) -> (i32, i32) {
    %c0_i32 = arith.constant 0 : i32
    %c0_i32_0 = arith.constant 0 : i32
    return %arg1, %c0_i32 : i32, i32
  }
  func.func @transform_2(%arg0: i32, %arg1: i32) -> (i32, i32) {
    %c0_i32 = arith.constant 0 : i32
    %c0_i32_0 = arith.constant 0 : i32
    %c0_i32_1 = arith.constant 0 : i32
    return %c0_i32, %c0_i32_0 : i32, i32
  }
  func.func @transform_3(%arg0: i32, %arg1: i32) -> (i32, i32) {
    %c0_i32 = arith.constant 0 : i32
    %c0_i32_0 = arith.constant 0 : i32
    %c0_i32_1 = arith.constant 0 : i32
    return %c0_i32, %c0_i32_0 : i32, i32
  }
  func.func @transform_4(%arg0: i32, %arg1: i32) -> (i32, i32) {
    %c0_i32 = arith.constant 0 : i32
    %c0_i32_0 = arith.constant 0 : i32
    %c0_i32_1 = arith.constant 0 : i32
    return %c0_i32, %c0_i32_0 : i32, i32
  }
  func.func @transform_5(%arg0: i32, %arg1: i32) -> (i32, i32) {
    %c0_i32 = arith.constant 0 : i32
    %c0_i32_0 = arith.constant 0 : i32
    return %arg0, %c0_i32 : i32, i32
  }
}

module attributes {stable_mosaic.version = 11 : i64} {
  func.func @gcn_stage2_kernel(%arg0: i32, %arg1: i32, %arg2: memref<128x128xbf16, #tpu.memory_space<vmem>>, %arg3: memref<128x128xbf16, #tpu.memory_space<vmem>>, %arg4: memref<1x128xf32, #tpu.memory_space<vmem>>, %arg5: memref<2x128xf32, #tpu.memory_space<vmem>>, %arg6: memref<1x2x128xf32, #tpu.memory_space<vmem>>, %arg7: memref<128x128xf32, #tpu.memory_space<vmem>>) attributes {dimension_semantics = [#tpu.dimension_semantics<parallel>, #tpu.dimension_semantics<arbitrary>], iteration_bounds = array<i64: 1, 1>, scalar_prefetch = 0 : i64, scratch_operands = 1 : i64, tpu.core_type = #tpu.core_type<tc>, window_params = [{transform_indices = @transform_0, window_bounds = array<i64: 128, 128>}, {transform_indices = @transform_1, window_bounds = array<i64: 128, 128>}, {pipeline_mode = #tpu.pipeline_mode<synchronous>, transform_indices = @transform_2, window_bounds = array<i64: 1, 128>}, {transform_indices = @transform_3, window_bounds = array<i64: 2, 128>}, {transform_indices = @transform_4, window_bounds = array<i64: 1, 2, 128>}]} {
    %c0_i32 = arith.constant 0 : i32
    %0 = arith.cmpi eq, %arg1, %c0_i32 : i32
    %1 = arith.extui %0 : i1 to i32
    %c0_i32_0 = arith.constant 0 : i32
    %2 = arith.cmpi ne, %1, %c0_i32_0 : i32
    scf.if %2 {
      %cst_10 = arith.constant 0.000000e+00 : f32
      %12 = vector.broadcast %cst_10 : f32 to vector<128x128xf32>
      %c0_11 = arith.constant 0 : index
      %c0_12 = arith.constant 0 : index
      %13 = vector.load %arg7[%c0_11, %c0_12] : memref<128x128xf32, #tpu.memory_space<vmem>>, vector<128x128xf32>
      tpu.vector_store %arg7[%c0_11, %c0_12], %12 {strides = array<i32>} : memref<128x128xf32, #tpu.memory_space<vmem>>, vector<128x128xf32>,
    } else {
    }
    %c0 = arith.constant 0 : index
    %c0_1 = arith.constant 0 : index
    %3 = vector.load %arg7[%c0, %c0_1] : memref<128x128xf32, #tpu.memory_space<vmem>>, vector<128x128xf32>
    %c0_2 = arith.constant 0 : index
    %c0_3 = arith.constant 0 : index
    %4 = vector.load %arg2[%c0_2, %c0_3] : memref<128x128xbf16, #tpu.memory_space<vmem>>, vector<128x128xbf16>
    %c0_4 = arith.constant 0 : index
    %c0_5 = arith.constant 0 : index
    %5 = vector.load %arg3[%c0_4, %c0_5] : memref<128x128xbf16, #tpu.memory_space<vmem>>, vector<128x128xbf16>
    %cst = arith.constant dense<0.000000e+00> : vector<128x128xf32>
    %6 = tpu.matmul %4, %5, %cst {dimension_numbers = #tpu.dot_dimension_numbers<[1], [0], [0], [1], [0, 0, 1, 1], [], []>} : vector<128x128xbf16>, vector<128x128xbf16>, vector<128x128xf32> -> vector<128x128xf32>
    %7 = arith.addf %3, %6 : vector<128x128xf32>
    %c0_6 = arith.constant 0 : index
    %c0_7 = arith.constant 0 : index
    %8 = vector.load %arg7[%c0_6, %c0_7] : memref<128x128xf32, #tpu.memory_space<vmem>>, vector<128x128xf32>
    tpu.vector_store %arg7[%c0_6, %c0_7], %7 {strides = array<i32>} : memref<128x128xf32, #tpu.memory_space<vmem>>, vector<128x128xf32>,
    %c0_i32_8 = arith.constant 0 : i32
    %9 = arith.cmpi eq, %arg1, %c0_i32_8 : i32
    %10 = arith.extui %9 : i1 to i32
    %c0_i32_9 = arith.constant 0 : i32
    %11 = arith.cmpi ne, %10, %c0_i32_9 : i32
    scf.if %11 {
      %c0_10 = arith.constant 0 : index
      %c0_11 = arith.constant 0 : index
      %12 = vector.load %arg7[%c0_10, %c0_11] : memref<128x128xf32, #tpu.memory_space<vmem>>, vector<128x128xf32>
      %c0_12 = arith.constant 0 : index
      %c0_13 = arith.constant 0 : index
      %13 = vector.load %arg4[%c0_12, %c0_13] : memref<1x128xf32, #tpu.memory_space<vmem>>, vector<1x128xf32>
      %14 = vector.broadcast %13 : vector<1x128xf32> to vector<128x128xf32>
      %15 = arith.addf %12, %14 : vector<128x128xf32>
      %cst_14 = arith.constant 0.000000e+00 : f32
      %16 = vector.broadcast %cst_14 : f32 to vector<128x128xf32>
      %17 = arith.maximumf %15, %16 : vector<128x128xf32>
      %c0_15 = arith.constant 0 : index
      %c0_16 = arith.constant 0 : index
      %18 = vector.load %arg5[%c0_15, %c0_16] : memref<2x128xf32, #tpu.memory_space<vmem>>, vector<2x128xf32>
      %cst_17 = arith.constant dense<0.000000e+00> : vector<2x128xf32>
      %19 = tpu.matmul %18, %17, %cst_17 {dimension_numbers = #tpu.dot_dimension_numbers<[1], [0], [0], [1], [0, 0, 1, 1], [], []>} : vector<2x128xf32>, vector<128x128xf32>, vector<2x128xf32> -> vector<2x128xf32>
      %c0_18 = arith.constant 0 : index
      %c0_19 = arith.constant 0 : index
      %c0_20 = arith.constant 0 : index
      %20 = vector.load %arg6[%c0_18, %c0_19, %c0_20] : memref<1x2x128xf32, #tpu.memory_space<vmem>>, vector<1x2x128xf32>
      %21 = vector.shape_cast %20 : vector<1x2x128xf32> to vector<2x128xf32>
      %22 = vector.shape_cast %19 : vector<2x128xf32> to vector<1x2x128xf32>
      tpu.vector_store %arg6[%c0_18, %c0_19, %c0_20], %22 {strides = array<i32>} : memref<1x2x128xf32, #tpu.memory_space<vmem>>, vector<1x2x128xf32>,
    } else {
    }
    return
  }
  func.func @transform_0(%arg0: i32, %arg1: i32) -> (i32, i32) {
    %c0_i32 = arith.constant 0 : i32
    return %arg0, %arg1 : i32, i32
  }
  func.func @transform_1(%arg0: i32, %arg1: i32) -> (i32, i32) {
    %c0_i32 = arith.constant 0 : i32
    %c0_i32_0 = arith.constant 0 : i32
    return %arg1, %c0_i32 : i32, i32
  }
  func.func @transform_2(%arg0: i32, %arg1: i32) -> (i32, i32) {
    %c0_i32 = arith.constant 0 : i32
    %c0_i32_0 = arith.constant 0 : i32
    %c0_i32_1 = arith.constant 0 : i32
    return %c0_i32, %c0_i32_0 : i32, i32
  }
  func.func @transform_3(%arg0: i32, %arg1: i32) -> (i32, i32) {
    %c0_i32 = arith.constant 0 : i32
    %c0_i32_0 = arith.constant 0 : i32
    return %c0_i32, %arg0 : i32, i32
  }
  func.func @transform_4(%arg0: i32, %arg1: i32) -> (i32, i32, i32) {
    %c0_i32 = arith.constant 0 : i32
    %c0_i32_0 = arith.constant 0 : i32
    %c0_i32_1 = arith.constant 0 : i32
    return %arg0, %c0_i32, %c0_i32_0 : i32, i32, i32
  }
}

</mosaic_0001>

<bundles_post_ra>
// kernel: adams_gcn_forward.2
= control target key start
LH: loop header
LB: loop body
LE: loop exit
PB: predicated region body
PF: predicated region fallthrough
CT: control target
= control target key end

     0   :  { %vm25_vm0 = vcmask 64512   ;;  %v1089_v1 = vmov 0.0   ;;  %s1270_s1 = inlined_call_operand.vmem [shape: bf16[128,8], index: 1, kind: input, shape index: {}]   ;;  %s1271_s0 = inlined_call_operand.vmem [shape: bf16[128,128], index: 0, kind: input, shape index: {}]   ;;  %s1272_s2 = inlined_call_operand.vmem [shape: f32[8,128], index: 2, kind: input, shape index: {}]   ;;  %s1273_s4 = inlined_call_operand.vmem [shape: bf16[128,128], index: 4, kind: input, shape index: {}]   ;;  %s1274_s3 = inlined_call_operand.vmem [shape: f32[1,128], index: 3, kind: input, shape index: {}]   ;;  %s1275_s5 = inlined_call_operand.vmem [shape: bf16[128,128], index: 5, kind: output, shape index: {}]  }
   0x1   :  { %v1065_v0 = vld [vmem:[%s1270_s1] sm:$0xff]   ;;  %28 = vst.msk [vmem:[#allocation2 + $0x10] sm:$0xff] %vm25_vm0, %v1089_v1  ;;  %26 = vst.msk [vmem:[#allocation2] sm:$0xff] %vm25_vm0, %v1089_v1  ;;  %v1066_v2 = vld [vmem:[%s1270_s1 + $0x8] sm:$0xff]  }
   0x2   :  { %27 = vst.msk [vmem:[#allocation2 + $0x8] sm:$0xff] %vm25_vm0, %v1089_v1  ;;  %29 = vst.msk [vmem:[#allocation2 + $0x18] sm:$0xff] %vm25_vm0, %v1089_v1  ;;  %974 = vmatprep.subr.bf16.mxu0 %v1065_v0  ;;  %v1067_v3 = vld [vmem:[%s1270_s1 + $0x10] sm:$0xff]   ;;  %v1068_v4 = vld [vmem:[%s1270_s1 + $0x18] sm:$0xff]  }
   0x3   :  { %30 = vst.msk [vmem:[#allocation2 + $0x20] sm:$0xff] %vm25_vm0, %v1089_v1  ;;  %31 = vst.msk [vmem:[#allocation2 + $0x28] sm:$0xff] %vm25_vm0, %v1089_v1  ;;  %975 = vmatpush3.bf16.msra.mxu0 %v1065_v0  ;;  %v1073_v5 = vld [vmem:[%s1271_s0] sm:$0xff]   ;;  %v1070_v7 = vld [vmem:[%s1270_s1 + $0x28] sm:$0xff]  }
   0x4   :  { %32 = vst.msk [vmem:[#allocation2 + $0x30] sm:$0xff] %vm25_vm0, %v1089_v1  ;;  %33 = vst.msk [vmem:[#allocation2 + $0x38] sm:$0xff] %vm25_vm0, %v1089_v1  ;;  %976 = vmatprep.subr.bf16.mxu0 %v1066_v2  ;;  %990 = vmatprep.mubr.bf16.mxu0 %v1073_v5  ;;  %v1069_v6 = vld [vmem:[%s1270_s1 + $0x20] sm:$0xff]   ;;  %v1071_v8 = vld [vmem:[%s1270_s1 + $0x30] sm:$0xff]  }
   0x5   :  { %34 = vst.msk [vmem:[#allocation2 + $0x40] sm:$0xff] %vm25_vm0, %v1089_v1  ;;  %35 = vst.msk [vmem:[#allocation2 + $0x48] sm:$0xff] %vm25_vm0, %v1089_v1  ;;  %v1072_v9 = vld [vmem:[%s1270_s1 + $0x38] sm:$0xff]   ;;  %v1074_v10 = vld [vmem:[%s1271_s0 + $0x8] sm:$0xff]  }
   0x6   :  { %36 = vst.msk [vmem:[#allocation2 + $0x50] sm:$0xff] %vm25_vm0, %v1089_v1  ;;  %37 = vst.msk [vmem:[#allocation2 + $0x58] sm:$0xff] %vm25_vm0, %v1089_v1  ;;  %v1075_v11 = vld [vmem:[%s1271_s0 + $0x10] sm:$0xff]   ;;  %v1076_v12 = vld [vmem:[%s1271_s0 + $0x18] sm:$0xff]  }
   0x7   :  { %38 = vst.msk [vmem:[#allocation2 + $0x60] sm:$0xff] %vm25_vm0, %v1089_v1  ;;  %39 = vst.msk [vmem:[#allocation2 + $0x68] sm:$0xff] %vm25_vm0, %v1089_v1  ;;  %977 = vmatpush3.bf16.msra.mxu0 %v1066_v2  ;;  %v1077_v13 = vld [vmem:[%s1271_s0 + $0x20] sm:$0xff]   ;;  %v1078_v14 = vld [vmem:[%s1271_s0 + $0x28] sm:$0xff]  }
   0x8   :  { %40 = vst.msk [vmem:[#allocation2 + $0x70] sm:$0xff] %vm25_vm0, %v1089_v1  ;;  %41 = vst.msk [vmem:[#allocation2 + $0x78] sm:$0xff] %vm25_vm0, %v1089_v1  ;;  %978 = vmatprep.subr.bf16.mxu0 %v1067_v3  ;;  %v1079_v15 = vld [vmem:[%s1271_s0 + $0x30] sm:$0xff]   ;;  %v1080_v16 = vld [vmem:[%s1271_s0 + $0x38] sm:$0xff]  }
   0x9   :  { %v335_v17 = vld [vmem:[%s1272_s2] sm:$0xff]  ;;  %v44_v19 = vld [vmem:[#allocation2 + $0x10] sm:$0xff]  ;;  %v45_v22 = vld [vmem:[#allocation2 + $0x18] sm:$0xff] }
   0xa   :  { %1006 = vmatprep.subr.mxu1 %v335_v17  ;;  %v1081_v18 = vld [vmem:[%s1273_s4] sm:$0xff]   ;;  %v43_v25 = vld [vmem:[#allocation2 + $0x8] sm:$0xff]  ;;  %v1083_v51 = vld [vmem:[%s1273_s4 + $0x10] sm:$0xff]  }
   0xb   :  { %979 = vmatpush3.bf16.msra.mxu0 %v1067_v3  ;;  %1007 = vmatpush3.msra.mxu1 %v335_v17  ;;  %v42_v20 = vld [vmem:[#allocation2] sm:$0xff]  ;;  %v48_v31 = vld [vmem:[#allocation2 + $0x30] sm:$0xff]  ;;  %v49_v34 = vld [vmem:[#allocation2 + $0x38] sm:$0xff] }
   0xc   :  { %980 = vmatprep.subr.bf16.mxu0 %v1068_v4  ;;  %1032 = vmatprep.subr.bf16.mxu1 %v1081_v18  ;;  %v46_v32 = vld [vmem:[#allocation2 + $0x20] sm:$0xff]  ;;  %v47_v37 = vld [vmem:[#allocation2 + $0x28] sm:$0xff]  ;;  %v1084_v62 = vld [vmem:[%s1273_s4 + $0x18] sm:$0xff]  }
   0xd   :  { %v1082_v44 = vld [vmem:[%s1273_s4 + $0x8] sm:$0xff]   ;;  %v52_v47 = vld [vmem:[#allocation2 + $0x50] sm:$0xff]  ;;  %v50_v48 = vld [vmem:[#allocation2 + $0x40] sm:$0xff] }
   0xe   :  { %v53_v50 = vld [vmem:[#allocation2 + $0x58] sm:$0xff]  ;;  %v51_v55 = vld [vmem:[#allocation2 + $0x48] sm:$0xff]  ;;  %v54_v2 = vld [vmem:[#allocation2 + $0x60] sm:$0xff] }
   0xf   :  { %981 = vmatpush3.bf16.msra.mxu0 %v1068_v4  ;;  %v56_v1 = vld [vmem:[#allocation2 + $0x70] sm:$0xff]  ;;  %v57_v4 = vld [vmem:[#allocation2 + $0x78] sm:$0xff]  ;;  %v1085_v5 = vld [vmem:[%s1273_s4 + $0x20] sm:$0xff]  }
  0x10   :  { %982 = vmatprep.subr.bf16.mxu0 %v1069_v6 }
  0x13   :  { %983 = vmatpush3.bf16.msra.mxu0 %v1069_v6 }
  0x14   :  { %984 = vmatprep.subr.bf16.mxu0 %v1070_v7 }
  0x17   :  { %985 = vmatpush3.bf16.msra.mxu0 %v1070_v7 }
  0x18   :  { %986 = vmatprep.subr.bf16.mxu0 %v1071_v8 }
  0x1b   :  { %987 = vmatpush3.bf16.msra.mxu0 %v1071_v8 }
  0x1c   :  { %988 = vmatprep.subr.bf16.mxu0 %v1072_v9 }
  0x1f   :  { %989 = vmatpush3.bf16.msra.mxu0 %v1072_v9  ;;  %v55_v9 = vld [vmem:[#allocation2 + $0x68] sm:$0xff] }
  0x22   :  { %991 = vmatmul.mubr.bf16.vlgmr.msra.gmra.mrb[0].mxu0 %v1074_v10 }
  0x23   :  { %994 = vmatprep.mubr.bf16.mxu0 %v1075_v11 }
  0x2a   :  { %995 = vmatmul.mubr.bf16.gmra.mrb[4].mxu0 %v1076_v12 }
  0x2b   :  { %998 = vmatprep.mubr.bf16.mxu0 %v1077_v13 }
  0x32   :  { %999 = vmatmul.mubr.bf16.gmra.mrb[8].mxu0 %v1078_v14 }
  0x33   :  { %1002 = vmatprep.mubr.bf16.mxu0 %v1079_v15 }
  0x3a   :  { %1003 = vmatmul.mubr.bf16.gmra.mrb[12].mxu0 %v1080_v16  ;;  %v1086_v16 = vld [vmem:[%s1273_s4 + $0x28] sm:$0xff]  }
  0xf5   :  { %v992_v21 = vpop.f32.mrb[0].mxu0 }
  0xf6   :  { %v285_v23 = vadd.f32 %v992_v21, %v44_v19  ;;  %v220_v24 = vpop.f32.mrb[1].mxu0 }
  0xf7   :  { %v283_v26 = vadd.f32 %v220_v24, %v42_v20  ;;  %v993_v27 = vpop.f32.mrb[2].mxu0  ;;  %v1087_v24 = vld [vmem:[%s1273_s4 + $0x30] sm:$0xff]  }
  0xf8   :  { %302 = vst.msk [vmem:[#allocation2 + $0x10] sm:$0xff] %vm25_vm0, %v285_v23  ;;  %v286_v28 = vadd.f32 %v993_v27, %v45_v22  ;;  %v223_v29 = vpop.f32.mrb[3].mxu0 }
  0xf9   :  { %300 = vst.msk [vmem:[#allocation2] sm:$0xff] %vm25_vm0, %v283_v26  ;;  %v284_v30 = vadd.f32 %v223_v29, %v43_v25  ;;  %v1088_v25 = vld [vmem:[%s1273_s4 + $0x38] sm:$0xff]   ;;  %v821_v26 = vld [vmem:[%s1274_s3] ss:$0 sm:$0xff] }
  0xfa   :  { %303 = vst.msk [vmem:[#allocation2 + $0x18] sm:$0xff] %vm25_vm0, %v286_v28 }
  0xfb   :  { %301 = vst.msk [vmem:[#allocation2 + $0x8] sm:$0xff] %vm25_vm0, %v284_v30 }
  0xfd   :  { %v996_v33 = vpop.f32.mrb[4].mxu0 }
  0xfe   :  { %v289_v35 = vadd.f32 %v996_v33, %v48_v31  ;;  %v236_v36 = vpop.f32.mrb[5].mxu0 }
  0xff   :  { %v287_v38 = vadd.f32 %v236_v36, %v46_v32  ;;  %v997_v39 = vpop.f32.mrb[6].mxu0  ;;  %v321_v46 = vld [vmem:[#allocation2 + $0x10] sm:$0xff] }
 0x100   :  { %306 = vst.msk [vmem:[#allocation2 + $0x30] sm:$0xff] %vm25_vm0, %v289_v35  ;;  %v290_v40 = vadd.f32 %v997_v39, %v49_v34  ;;  %v239_v41 = vpop.f32.mrb[7].mxu0  ;;  %v319_v42 = vld [vmem:[#allocation2] sm:$0xff] }
 0x101   :  { %304 = vst.msk [vmem:[#allocation2 + $0x20] sm:$0xff] %vm25_vm0, %v287_v38  ;;  %v288_v43 = vadd.f32 %v239_v41, %v47_v37  ;;  %1008 = vmatprep.mubr.msk.f32.mxu1 %vm25_vm0, %v319_v42  ;;  %v322_v54 = vld [vmem:[#allocation2 + $0x18] sm:$0xff] }
 0x102   :  { %307 = vst.msk [vmem:[#allocation2 + $0x38] sm:$0xff] %vm25_vm0, %v290_v40  ;;  %v320_v45 = vld [vmem:[#allocation2 + $0x8] sm:$0xff] }
 0x103   :  { %305 = vst.msk [vmem:[#allocation2 + $0x28] sm:$0xff] %vm25_vm0, %v288_v43  ;;  %1009 = vmatmul.mubr.msk.f32.vlgmr.msra.gmra.mrb[0].mxu1 %vm25_vm0, %v320_v45 }
 0x104   :  { %1011 = vmatprep.mubr.msk.f32.mxu1 %vm25_vm0, %v321_v46  ;;  %1033 = vmatpush3.bf16.msra.mxu1 %v1081_v18 }
 0x105   :  { %v1000_v49 = vpop.f32.mrb[8].mxu0  ;;  %1034 = vmatprep.subr.bf16.mxu1 %v1082_v44 }
 0x106   :  { %v293_v52 = vadd.f32 %v1000_v49, %v52_v47  ;;  %v252_v53 = vpop.f32.mrb[9].mxu0 }
 0x107   :  { %v291_v56 = vadd.f32 %v252_v53, %v50_v48  ;;  %v1001_v57 = vpop.f32.mrb[10].mxu0  ;;  %1012 = vmatmul.mubr.msk.f32.gmra.mrb[2].mxu1 %vm25_vm0, %v322_v54  ;;  %v325_v0 = vld [vmem:[#allocation2 + $0x30] sm:$0xff] }
 0x108   :  { %310 = vst.msk [vmem:[#allocation2 + $0x50] sm:$0xff] %vm25_vm0, %v293_v52  ;;  %v294_v58 = vadd.f32 %v1001_v57, %v53_v50  ;;  %v255_v59 = vpop.f32.mrb[11].mxu0  ;;  %v323_v60 = vld [vmem:[#allocation2 + $0x20] sm:$0xff]  ;;  %1035 = vmatpush3.bf16.msra.mxu1 %v1082_v44 }
 0x109   :  { %308 = vst.msk [vmem:[#allocation2 + $0x40] sm:$0xff] %vm25_vm0, %v291_v56  ;;  %v292_v61 = vadd.f32 %v255_v59, %v51_v55  ;;  %1014 = vmatprep.mubr.msk.f32.mxu1 %vm25_vm0, %v323_v60  ;;  %1036 = vmatprep.subr.bf16.mxu1 %v1083_v51  ;;  %v326_v8 = vld [vmem:[#allocation2 + $0x38] sm:$0xff] }
 0x10a   :  { %311 = vst.msk [vmem:[#allocation2 + $0x58] sm:$0xff] %vm25_vm0, %v294_v58  ;;  %v324_v63 = vld [vmem:[#allocation2 + $0x28] sm:$0xff] }
 0x10b   :  { %309 = vst.msk [vmem:[#allocation2 + $0x48] sm:$0xff] %vm25_vm0, %v292_v61  ;;  %1015 = vmatmul.mubr.msk.f32.gmra.mrb[4].mxu1 %vm25_vm0, %v324_v63 }
 0x10c   :  { %1017 = vmatprep.mubr.msk.f32.mxu1 %vm25_vm0, %v325_v0  ;;  %1037 = vmatpush3.bf16.msra.mxu1 %v1083_v51 }
 0x10d   :  { %v1004_v3 = vpop.f32.mrb[12].mxu0  ;;  %1038 = vmatprep.subr.bf16.mxu1 %v1084_v62 }
 0x10e   :  { %v297_v6 = vadd.f32 %v1004_v3, %v56_v1  ;;  %v268_v7 = vpop.f32.mrb[13].mxu0 }
 0x10f   :  { %v295_v10 = vadd.f32 %v268_v7, %v54_v2  ;;  %v1005_v11 = vpop.f32.mrb[14].mxu0  ;;  %1018 = vmatmul.mubr.msk.f32.gmra.mrb[6].mxu1 %vm25_vm0, %v326_v8  ;;  %v329_v18 = vld [vmem:[#allocation2 + $0x50] sm:$0xff] }
 0x110   :  { %314 = vst.msk [vmem:[#allocation2 + $0x70] sm:$0xff] %vm25_vm0, %v297_v6  ;;  %v298_v12 = vadd.f32 %v1005_v11, %v57_v4  ;;  %v271_v13 = vpop.f32.mrb[15].mxu0  ;;  %v327_v14 = vld [vmem:[#allocation2 + $0x40] sm:$0xff]  ;;  %1039 = vmatpush3.bf16.msra.mxu1 %v1084_v62 }
 0x111   :  { %312 = vst.msk [vmem:[#allocation2 + $0x60] sm:$0xff] %vm25_vm0, %v295_v10  ;;  %v296_v15 = vadd.f32 %v271_v13, %v55_v9  ;;  %1020 = vmatprep.mubr.msk.f32.mxu1 %vm25_vm0, %v327_v14  ;;  %1040 = vmatprep.subr.bf16.mxu1 %v1085_v5  ;;  %v330_v19 = vld [vmem:[#allocation2 + $0x58] sm:$0xff] }
 0x112   :  { %315 = vst.msk [vmem:[#allocation2 + $0x78] sm:$0xff] %vm25_vm0, %v298_v12  ;;  %v328_v17 = vld [vmem:[#allocation2 + $0x48] sm:$0xff] }
 0x113   :  { %313 = vst.msk [vmem:[#allocation2 + $0x68] sm:$0xff] %vm25_vm0, %v296_v15  ;;  %1021 = vmatmul.mubr.msk.f32.gmra.mrb[8].mxu1 %vm25_vm0, %v328_v17 }
 0x114   :  { %1023 = vmatprep.mubr.msk.f32.mxu1 %vm25_vm0, %v329_v18  ;;  %1041 = vmatpush3.bf16.msra.mxu1 %v1085_v5 }
 0x115   :  { %1042 = vmatprep.subr.bf16.mxu1 %v1086_v16 }
 0x117   :  { %1024 = vmatmul.mubr.msk.f32.gmra.mrb[10].mxu1 %vm25_vm0, %v330_v19  ;;  %v333_v22 = vld [vmem:[#allocation2 + $0x70] sm:$0xff] }
 0x118   :  { %v331_v20 = vld [vmem:[#allocation2 + $0x60] sm:$0xff]  ;;  %1043 = vmatpush3.bf16.msra.mxu1 %v1086_v16 }
 0x119   :  { %1026 = vmatprep.mubr.msk.f32.mxu1 %vm25_vm0, %v331_v20  ;;  %v334_v23 = vld [vmem:[#allocation2 + $0x78] sm:$0xff]  ;;  %1044 = vmatprep.subr.bf16.mxu1 %v1087_v24 }
 0x11a   :  { %v332_v21 = vld [vmem:[#allocation2 + $0x68] sm:$0xff] }
 0x11b   :  { %1027 = vmatmul.mubr.msk.f32.gmra.mrb[12].mxu1 %vm25_vm0, %v332_v21 }
 0x11c   :  { %1029 = vmatprep.mubr.msk.f32.mxu1 %vm25_vm0, %v333_v22  ;;  %1045 = vmatpush3.bf16.msra.mxu1 %v1087_v24 }
 0x11d   :  { %1046 = vmatprep.subr.bf16.mxu1 %v1088_v25 }
 0x11f   :  { %1030 = vmatmul.mubr.msk.f32.gmra.mrb[14].mxu1 %vm25_vm0, %v334_v23 }
 0x120   :  { %1047 = vmatpush3.bf16.msra.mxu1 %v1088_v25 }
 0x1d6   :  { %v1010_v27 = vpop.f32.mrb[0].mxu1 }
 0x1d7   :  { %v463_v28 = vadd.f32 %v1010_v27, %v821_v26  ;;  %v457_v29 = vpop.f32.mrb[1].mxu1 }
 0x1d8   :  { %v458_v30 = vadd.f32 %v821_v26, %v457_v29 }
 0x1d9   :  { %v537_v31 = vmax.f32 %v463_v28, 0.0 }
 0x1da   :  { %v536_v32 = vmax.f32 %v458_v30, 0.0  ;;  %v1013_v33 = vpop.f32.mrb[2].mxu1 }
 0x1db   :  { %v473_v34 = vadd.f32 %v1013_v33, %v821_v26  ;;  %v467_v35 = vpop.f32.mrb[3].mxu1 }
 0x1dc   :  { %v552_v36 = vpack.c.bf16 %v537_v31, %v536_v32  ;;  %v468_v37 = vadd.f32 %v821_v26, %v467_v35 }
 0x1dd   :  { %v539_v38 = vmax.f32 %v473_v34, 0.0 }
 0x1de   :  { %v538_v39 = vmax.f32 %v468_v37, 0.0  ;;  %v1016_v40 = vpop.f32.mrb[4].mxu1  ;;  %1048 = vmatprep.mubr.bf16.mxu1 %v552_v36 }
 0x1df   :  { %v483_v41 = vadd.f32 %v1016_v40, %v821_v26  ;;  %v477_v42 = vpop.f32.mrb[5].mxu1 }
 0x1e0   :  { %v553_v43 = vpack.c.bf16 %v539_v38, %v538_v39  ;;  %v478_v44 = vadd.f32 %v821_v26, %v477_v42 }
 0x1e1   :  { %v541_v45 = vmax.f32 %v483_v41, 0.0 }
 0x1e2   :  { %v540_v46 = vmax.f32 %v478_v44, 0.0  ;;  %v1019_v47 = vpop.f32.mrb[6].mxu1  ;;  %1049 = vmatmul.mubr.bf16.vlgmr.msra.gmra.mrb[16].mxu1 %v553_v43 }
 0x1e3   :  { %v493_v48 = vadd.f32 %v1019_v47, %v821_v26  ;;  %v487_v49 = vpop.f32.mrb[7].mxu1 }
 0x1e4   :  { %v554_v50 = vpack.c.bf16 %v541_v45, %v540_v46  ;;  %v488_v51 = vadd.f32 %v821_v26, %v487_v49 }
 0x1e5   :  { %v543_v52 = vmax.f32 %v493_v48, 0.0 }
 0x1e6   :  { %v542_v53 = vmax.f32 %v488_v51, 0.0  ;;  %v1022_v54 = vpop.f32.mrb[8].mxu1  ;;  %1052 = vmatprep.mubr.bf16.mxu1 %v554_v50 }
 0x1e7   :  { %v503_v55 = vadd.f32 %v1022_v54, %v821_v26  ;;  %v497_v56 = vpop.f32.mrb[9].mxu1 }
 0x1e8   :  { %v555_v57 = vpack.c.bf16 %v543_v52, %v542_v53  ;;  %v498_v58 = vadd.f32 %v821_v26, %v497_v56 }
 0x1e9   :  { %v545_v59 = vmax.f32 %v503_v55, 0.0 }
 0x1ea   :  { %v544_v60 = vmax.f32 %v498_v58, 0.0  ;;  %v1025_v61 = vpop.f32.mrb[10].mxu1  ;;  %1053 = vmatmul.mubr.bf16.gmra.mrb[20].mxu1 %v555_v57 }
 0x1eb   :  { %v513_v62 = vadd.f32 %v1025_v61, %v821_v26  ;;  %v507_v63 = vpop.f32.mrb[11].mxu1 }
 0x1ec   :  { %v556_v0 = vpack.c.bf16 %v545_v59, %v544_v60  ;;  %v508_v1 = vadd.f32 %v821_v26, %v507_v63 }
 0x1ed   :  { %v547_v2 = vmax.f32 %v513_v62, 0.0 }
 0x1ee   :  { %v546_v3 = vmax.f32 %v508_v1, 0.0  ;;  %v1028_v4 = vpop.f32.mrb[12].mxu1  ;;  %1056 = vmatprep.mubr.bf16.mxu1 %v556_v0 }
 0x1ef   :  { %v523_v5 = vadd.f32 %v1028_v4, %v821_v26  ;;  %v517_v6 = vpop.f32.mrb[13].mxu1 }
 0x1f0   :  { %v557_v7 = vpack.c.bf16 %v547_v2, %v546_v3  ;;  %v518_v8 = vadd.f32 %v821_v26, %v517_v6 }
 0x1f1   :  { %v549_v9 = vmax.f32 %v523_v5, 0.0 }
 0x1f2   :  { %v548_v10 = vmax.f32 %v518_v8, 0.0  ;;  %v1031_v11 = vpop.f32.mrb[14].mxu1  ;;  %1057 = vmatmul.mubr.bf16.gmra.mrb[24].mxu1 %v557_v7 }
 0x1f3   :  { %v533_v12 = vadd.f32 %v1031_v11, %v821_v26  ;;  %v527_v13 = vpop.f32.mrb[15].mxu1 }
 0x1f4   :  { %v558_v14 = vpack.c.bf16 %v549_v9, %v548_v10  ;;  %v528_v15 = vadd.f32 %v821_v26, %v527_v13 }
 0x1f5   :  { %v551_v16 = vmax.f32 %v533_v12, 0.0 }
 0x1f6   :  { %v550_v17 = vmax.f32 %v528_v15, 0.0  ;;  %1060 = vmatprep.mubr.bf16.mxu1 %v558_v14 }
 0x1f8   :  { %v559_v18 = vpack.c.bf16 %v551_v16, %v550_v17 }
 0x1fa   :  { %1061 = vmatmul.mubr.bf16.gmra.mrb[28].mxu1 %v559_v18 }
 0x2b5   :  { %v1050_v19 = vpop.f32.mrb[16].mxu1 }
 0x2b6   :  { %v658_v20 = vpop.f32.mrb[17].mxu1 }
 0x2b7   :  { %v1051_v21 = vpop.f32.mrb[18].mxu1 }
 0x2b8   :  { %v886_v22 = vpack.c.bf16 %v1051_v21, %v1050_v19  ;;  %v661_v23 = vpop.f32.mrb[19].mxu1 }
 0x2b9   :  { %v881_v24 = vpack.c.bf16 %v661_v23, %v658_v20 }
 0x2ba   :  { %918 = vst [vmem:[%s1275_s5 + $0x8] sm:$0xff] %v886_v22  }
 0x2bb   :  { %882 = vst [vmem:[%s1275_s5] sm:$0xff] %v881_v24  }
 0x2bd   :  { %v1054_v25 = vpop.f32.mrb[20].mxu1 }
 0x2be   :  { %v674_v26 = vpop.f32.mrb[21].mxu1 }
 0x2bf   :  { %v1055_v27 = vpop.f32.mrb[22].mxu1 }
 0x2c0   :  { %v896_v28 = vpack.c.bf16 %v1055_v27, %v1054_v25  ;;  %v677_v29 = vpop.f32.mrb[23].mxu1 }
 0x2c1   :  { %v891_v30 = vpack.c.bf16 %v677_v29, %v674_v26 }
 0x2c2   :  { %920 = vst [vmem:[%s1275_s5 + $0x18] sm:$0xff] %v896_v28  }
 0x2c3   :  { %919 = vst [vmem:[%s1275_s5 + $0x10] sm:$0xff] %v891_v30  }
 0x2c5   :  { %v1058_v31 = vpop.f32.mrb[24].mxu1 }
 0x2c6   :  { %v690_v32 = vpop.f32.mrb[25].mxu1 }
 0x2c7   :  { %v1059_v33 = vpop.f32.mrb[26].mxu1 }
 0x2c8   :  { %v906_v34 = vpack.c.bf16 %v1059_v33, %v1058_v31  ;;  %v693_v35 = vpop.f32.mrb[27].mxu1 }
 0x2c9   :  { %v901_v36 = vpack.c.bf16 %v693_v35, %v690_v32 }
 0x2ca   :  { %922 = vst [vmem:[%s1275_s5 + $0x28] sm:$0xff] %v906_v34  }
 0x2cb   :  { %921 = vst [vmem:[%s1275_s5 + $0x20] sm:$0xff] %v901_v36  }
 0x2cd   :  { %v1062_v37 = vpop.f32.mrb[28].mxu1 }
 0x2ce   :  { %v706_v38 = vpop.f32.mrb[29].mxu1 }
 0x2cf   :  { %v1063_v39 = vpop.f32.mrb[30].mxu1 }
 0x2d0   :  { %v916_v40 = vpack.c.bf16 %v1063_v39, %v1062_v37  ;;  %v709_v41 = vpop.f32.mrb[31].mxu1 }
 0x2d1   :  { %v911_v42 = vpack.c.bf16 %v709_v41, %v706_v38 }
 0x2d2   :  { %924 = vst [vmem:[%s1275_s5 + $0x38] sm:$0xff] %v916_v40  }
 0x2d3   :  { %923 = vst [vmem:[%s1275_s5 + $0x30] sm:$0xff] %v911_v42  }

// kernel: adams_gcn_forward.3
= control target key start
LH: loop header
LB: loop body
LE: loop exit
PB: predicated region body
PF: predicated region fallthrough
CT: control target
= control target key end

     0   :  { %v605_v16 = vmov 0.0|0.0   ;;  %vm606_vm0 = vmmov 0   ;;  %v607_v17 = vmov 0.0   ;;  %s698_s1 = inlined_call_operand.vmem [shape: bf16[128,128], index: 1, kind: input, shape index: {}]   ;;  %s699_s0 = inlined_call_operand.vmem [shape: bf16[128,128], index: 0, kind: input, shape index: {}]   ;;  %s700_s2 = inlined_call_operand.vmem [shape: f32[1,128], index: 2, kind: input, shape index: {}]   ;;  %s701_s3 = inlined_call_operand.vmem [shape: f32[2,128], index: 3, kind: input, shape index: {}]   ;;  %s702_s4 = inlined_call_operand.vmem [shape: f32[1,2,128], index: 4, kind: output, shape index: {}]  }
   0x1   :  { %v589_v0 = vld [vmem:[%s698_s1] sm:$0xff]   ;;  %v590_v1 = vld [vmem:[%s698_s1 + $0x8] sm:$0xff]   ;;  %v591_v2 = vld [vmem:[%s698_s1 + $0x10] sm:$0xff]   ;;  %562 = vmatprep.subr.bf16.mxu1 %v605_v16  ;;  %559 = vmatprep.mubr.msk.f32.mxu1 %vm606_vm0, %v607_v17 }
   0x2   :  { %495 = vmatprep.subr.bf16.mxu0 %v589_v0  ;;  %v592_v3 = vld [vmem:[%s698_s1 + $0x18] sm:$0xff]   ;;  %v597_v4 = vld [vmem:[%s699_s0] sm:$0xff]   ;;  %v594_v6 = vld [vmem:[%s698_s1 + $0x28] sm:$0xff]  }
   0x3   :  { %496 = vmatpush3.bf16.msra.mxu0 %v589_v0  ;;  %511 = vmatprep.mubr.bf16.mxu0 %v597_v4  ;;  %v593_v5 = vld [vmem:[%s698_s1 + $0x20] sm:$0xff]   ;;  %v595_v7 = vld [vmem:[%s698_s1 + $0x30] sm:$0xff]   ;;  %v596_v8 = vld [vmem:[%s698_s1 + $0x38] sm:$0xff]  }
   0x4   :  { %497 = vmatprep.subr.bf16.mxu0 %v590_v1  ;;  %v598_v9 = vld [vmem:[%s699_s0 + $0x8] sm:$0xff]   ;;  %v599_v10 = vld [vmem:[%s699_s0 + $0x10] sm:$0xff]   ;;  %v600_v11 = vld [vmem:[%s699_s0 + $0x18] sm:$0xff]  }
   0x5   :  { %v601_v12 = vld [vmem:[%s699_s0 + $0x20] sm:$0xff]   ;;  %v602_v13 = vld [vmem:[%s699_s0 + $0x28] sm:$0xff]   ;;  %v603_v14 = vld [vmem:[%s699_s0 + $0x30] sm:$0xff]  }
   0x6   :  { %v604_v15 = vld [vmem:[%s699_s0 + $0x38] sm:$0xff]   ;;  %v461_v18 = vld [vmem:[%s700_s2] ss:$0 sm:$0xff] }
   0x7   :  { %498 = vmatpush3.bf16.msra.mxu0 %v590_v1 }
   0x8   :  { %499 = vmatprep.subr.bf16.mxu0 %v591_v2 }
   0xb   :  { %500 = vmatpush3.bf16.msra.mxu0 %v591_v2 }
   0xc   :  { %501 = vmatprep.subr.bf16.mxu0 %v592_v3 }
   0xf   :  { %502 = vmatpush3.bf16.msra.mxu0 %v592_v3 }
  0x10   :  { %503 = vmatprep.subr.bf16.mxu0 %v593_v5 }
  0x13   :  { %504 = vmatpush3.bf16.msra.mxu0 %v593_v5 }
  0x14   :  { %505 = vmatprep.subr.bf16.mxu0 %v594_v6 }
  0x17   :  { %506 = vmatpush3.bf16.msra.mxu0 %v594_v6 }
  0x18   :  { %507 = vmatprep.subr.bf16.mxu0 %v595_v7 }
  0x1b   :  { %508 = vmatpush3.bf16.msra.mxu0 %v595_v7 }
  0x1c   :  { %509 = vmatprep.subr.bf16.mxu0 %v596_v8 }
  0x1f   :  { %510 = vmatpush3.bf16.msra.mxu0 %v596_v8 }
  0x22   :  { %512 = vmatmul.mubr.bf16.vlgmr.msra.gmra.mrb[0].mxu0 %v598_v9 }
  0x23   :  { %515 = vmatprep.mubr.bf16.mxu0 %v599_v10 }
  0x2a   :  { %516 = vmatmul.mubr.bf16.gmra.mrb[4].mxu0 %v600_v11  ;;  %v369_v11 = vld [vmem:[%s701_s3] sm:$0x3] }
  0x2b   :  { %519 = vmatprep.mubr.bf16.mxu0 %v601_v12 }
  0x32   :  { %520 = vmatmul.mubr.bf16.gmra.mrb[8].mxu0 %v602_v13 }
  0x33   :  { %523 = vmatprep.mubr.bf16.mxu0 %v603_v14 }
  0x3a   :  { %524 = vmatmul.mubr.bf16.gmra.mrb[12].mxu0 %v604_v15 }
  0xf5   :  { %v513_v19 = vpop.f32.mrb[0].mxu0 }
  0xf6   :  { %v339_v20 = vadd.f32 %v513_v19, %v461_v18  ;;  %v216_v21 = vpop.f32.mrb[1].mxu0 }
  0xf7   :  { %v337_v22 = vadd.f32 %v461_v18, %v216_v21  ;;  %v514_v23 = vpop.f32.mrb[2].mxu0 }
  0xf8   :  { %v340_v24 = vadd.f32 %v514_v23, %v461_v18  ;;  %v219_v25 = vpop.f32.mrb[3].mxu0  ;;  %v355_v27 = vmax.f32 %v339_v20, 0.0 }
  0xf9   :  { %v338_v26 = vadd.f32 %v461_v18, %v219_v25  ;;  %v353_v29 = vmax.f32 %v337_v22, 0.0 }
  0xfa   :  { %v356_v28 = vmax.f32 %v340_v24, 0.0 }
  0xfb   :  { %v354_v30 = vmax.f32 %v338_v26, 0.0 }
  0xfc   :  { %v566_v31 = vpack.c.bf16 %v356_v28, %v355_v27 }
  0xfd   :  { %v517_v32 = vpop.f32.mrb[4].mxu0  ;;  %v563_v33 = vpack.c.bf16 %v354_v30, %v353_v29 }
  0xfe   :  { %v343_v34 = vadd.f32 %v517_v32, %v461_v18  ;;  %v232_v35 = vpop.f32.mrb[5].mxu0 }
  0xff   :  { %v341_v36 = vadd.f32 %v461_v18, %v232_v35  ;;  %v518_v37 = vpop.f32.mrb[6].mxu0  ;;  %564 = vmatpush3.bf16.msra.mxu1 %v563_v33 }
 0x100   :  { %v344_v38 = vadd.f32 %v518_v37, %v461_v18  ;;  %v235_v39 = vpop.f32.mrb[7].mxu0  ;;  %565 = vmatprep.subr.bf16.mxu1 %v605_v16  ;;  %v359_v41 = vmax.f32 %v343_v34, 0.0 }
 0x101   :  { %v342_v40 = vadd.f32 %v461_v18, %v235_v39  ;;  %v357_v43 = vmax.f32 %v341_v36, 0.0 }
 0x102   :  { %v360_v42 = vmax.f32 %v344_v38, 0.0 }
 0x103   :  { %v358_v44 = vmax.f32 %v342_v40, 0.0  ;;  %567 = vmatpush3.bf16.msra.mxu1 %v566_v31 }
 0x104   :  { %v572_v45 = vpack.c.bf16 %v360_v42, %v359_v41  ;;  %568 = vmatprep.subr.bf16.mxu1 %v605_v16 }
 0x105   :  { %v569_v46 = vpack.c.bf16 %v358_v44, %v357_v43  ;;  %v521_v47 = vpop.f32.mrb[8].mxu0 }
 0x106   :  { %v347_v48 = vadd.f32 %v521_v47, %v461_v18  ;;  %v248_v49 = vpop.f32.mrb[9].mxu0 }
 0x107   :  { %v345_v50 = vadd.f32 %v461_v18, %v248_v49  ;;  %v522_v51 = vpop.f32.mrb[10].mxu0  ;;  %570 = vmatpush3.bf16.msra.mxu1 %v569_v46 }
 0x108   :  { %v348_v52 = vadd.f32 %v522_v51, %v461_v18  ;;  %v251_v53 = vpop.f32.mrb[11].mxu0  ;;  %571 = vmatprep.subr.bf16.mxu1 %v605_v16  ;;  %v363_v55 = vmax.f32 %v347_v48, 0.0 }
 0x109   :  { %v346_v54 = vadd.f32 %v461_v18, %v251_v53  ;;  %v361_v57 = vmax.f32 %v345_v50, 0.0 }
 0x10a   :  { %v364_v56 = vmax.f32 %v348_v52, 0.0 }
 0x10b   :  { %v362_v58 = vmax.f32 %v346_v54, 0.0  ;;  %573 = vmatpush3.bf16.msra.mxu1 %v572_v45 }
 0x10c   :  { %v578_v59 = vpack.c.bf16 %v364_v56, %v363_v55  ;;  %574 = vmatprep.subr.bf16.mxu1 %v605_v16 }
 0x10d   :  { %v575_v60 = vpack.c.bf16 %v362_v58, %v361_v57  ;;  %v525_v61 = vpop.f32.mrb[12].mxu0 }
 0x10e   :  { %v351_v62 = vadd.f32 %v525_v61, %v461_v18  ;;  %v264_v63 = vpop.f32.mrb[13].mxu0 }
 0x10f   :  { %v349_v0 = vadd.f32 %v461_v18, %v264_v63  ;;  %v526_v1 = vpop.f32.mrb[14].mxu0  ;;  %576 = vmatpush3.bf16.msra.mxu1 %v575_v60 }
 0x110   :  { %v352_v2 = vadd.f32 %v526_v1, %v461_v18  ;;  %v267_v3 = vpop.f32.mrb[15].mxu0  ;;  %577 = vmatprep.subr.bf16.mxu1 %v605_v16  ;;  %v367_v5 = vmax.f32 %v351_v62, 0.0 }
 0x111   :  { %v350_v4 = vadd.f32 %v461_v18, %v267_v3  ;;  %v365_v7 = vmax.f32 %v349_v0, 0.0 }
 0x112   :  { %v368_v6 = vmax.f32 %v352_v2, 0.0 }
 0x113   :  { %v366_v8 = vmax.f32 %v350_v4, 0.0  ;;  %579 = vmatpush3.bf16.msra.mxu1 %v578_v59 }
 0x114   :  { %v584_v9 = vpack.c.bf16 %v368_v6, %v367_v5  ;;  %580 = vmatprep.subr.bf16.mxu1 %v605_v16 }
 0x115   :  { %v581_v10 = vpack.c.bf16 %v366_v8, %v365_v7 }
 0x117   :  { %582 = vmatpush3.bf16.msra.mxu1 %v581_v10 }
 0x118   :  { %583 = vmatprep.subr.bf16.mxu1 %v605_v16 }
 0x11b   :  { %585 = vmatpush3.bf16.msra.mxu1 %v584_v9 }
 0x11e   :  { %560 = vmatmul.mubr.f32.vlgmr.msra.gmra.mrb[0].mxu1 %v369_v11 }
 0x1f1   :  { %v436_v12 = vpop.f32.mrb[0].mxu1 }
 0x1f2   :  { %440 = vst [vmem:[%s702_s4] sm:$0x3] %v436_v12  ;;  %v561_v13 = vpop.f32.mrb[1].mxu1 }

</bundles_post_ra>
